<compile_context>
chip_gen: v6e
topology: v6e:2x2x1
jax: 0.10.0
libtpu: 0.0.40
codegen_flags: <defaults>
</compile_context>

<pallas_src>
import functools

import jax
import jax.numpy as jnp
from jax.experimental import pallas as pl
from jax.experimental.pallas import tpu as pltpu


def _pad_to(v, m):
    return (v + m - 1) // m * m


# ---------------------------------------------------------------------------
# Generic fused GEMM + bias + activation kernel:  o = act(x @ w + b)
#   x: [tm, tk] f32   w: [tk, Np] bf16 (cast to f32 on-chip)   b: [1, Np] f32
# Grid = (M tiles ["parallel"], K tiles ["arbitrary"]). Bias is hoisted into the
# accumulator init (no per-step broadcast); activation runs once in the epilogue.
# ---------------------------------------------------------------------------
def _gemm_kernel(x_ref, w_ref, b_ref, o_ref, acc_ref, *, act):
    k = pl.program_id(1)

    @pl.when(k == 0)
    def _():
        acc_ref[...] = jnp.broadcast_to(
            b_ref[...].astype(jnp.float32), acc_ref.shape)

    acc_ref[...] += jnp.dot(
        x_ref[...],
        w_ref[...].astype(jnp.float32),
        preferred_element_type=jnp.float32,
    )

    @pl.when(k == pl.num_programs(1) - 1)
    def _():
        y = acc_ref[...]
        if act == "relu":
            y = jnp.maximum(y, 0.0)
        elif act == "relu6":
            y = jnp.clip(y, 0.0, 6.0)
        o_ref[...] = y.astype(o_ref.dtype)


def gemm_bias_act(x, w, b, act):
    """act(x @ w + b) with x:[M,K] f32, w:[K,N] bf16, b:[1,N] f32 -> [M,N] f32."""
    M, K = x.shape
    K2, N = w.shape
    assert K == K2, (K, K2)

    Np = _pad_to(N, 128)                       # lane-dense output / weight columns
    if K <= 2048:                              # K tiling: stream big weights in chunks
        tk = _pad_to(K, 128)
        Kp = tk
    else:
        tk = 2048
        Kp = _pad_to(K, tk)
    Mp = _pad_to(M, 8)
    tm = Mp if Mp <= 512 else 256              # batch tiles shard across TCs on v7x
    Mp = _pad_to(Mp, tm)

    xp = jnp.zeros((Mp, Kp), jnp.float32).at[:M, :K].set(x.astype(jnp.float32))
    wp = jnp.zeros((Kp, Np), jnp.bfloat16).at[:K, :N].set(w.astype(jnp.bfloat16))
    bp = jnp.zeros((1, Np), jnp.float32).at[:, :N].set(
        b.reshape(1, N).astype(jnp.float32))

    n_m = Mp // tm
    n_k = Kp // tk

    out = pl.pallas_call(
        functools.partial(_gemm_kernel, act=act),
        out_shape=jax.ShapeDtypeStruct((Mp, Np), jnp.float32),
        grid=(n_m, n_k),
        in_specs=[
            pl.BlockSpec((tm, tk), lambda i, k: (i, k)),
            pl.BlockSpec((tk, Np), lambda i, k: (k, 0)),   # constant over M
            pl.BlockSpec((1, Np), lambda i, k: (0, 0)),    # bias, constant
        ],
        out_specs=pl.BlockSpec((tm, Np), lambda i, k: (i, 0)),
        scratch_shapes=[pltpu.VMEM((tm, Np), jnp.float32)],
        compiler_params=pltpu.CompilerParams(
            dimension_semantics=("parallel", "arbitrary")),
        cost_estimate=pl.CostEstimate(
            flops=2 * Mp * Kp * Np,
            transcendentals=0,
            bytes_accessed=Mp * Kp * 4 + Kp * Np * 2 + Np * 4 + Mp * Np * 4),
    )(xp, wp, bp)
    return out[:M, :N]


# ---------------------------------------------------------------------------
# Conv layers = im2col (layout only) + fused Pallas GEMM.
# ---------------------------------------------------------------------------
def _im2col_3x3(x_nhwc, stride):
    # Zero-pad + strided slicing only; column order = (kh, kw, cin) to match
    # the weight layout reshape(3*3*Cin, Cout).
    B, H, W, C = x_nhwc.shape
    xp = jnp.pad(x_nhwc, ((0, 0), (1, 1), (1, 1), (0, 0)))
    OH = (H + 2 - 3) // stride + 1
    OW = (W + 2 - 3) // stride + 1
    cols = []
    for kh in range(3):
        for kw in range(3):
            cols.append(xp[:, kh:kh + stride * (OH - 1) + 1:stride,
                           kw:kw + stride * (OW - 1) + 1:stride, :])
    cols = jnp.concatenate(cols, axis=-1)              # [B, OH, OW, 9*C]
    return cols.reshape(B * OH * OW, 9 * C), (B, OH, OW)


def conv2d_bn_act(x_nhwc, w_flat, b, *, ksize, stride, act):
    B, H, W, C = x_nhwc.shape
    if ksize == 1:
        cols, (OB, OH, OW) = x_nhwc.reshape(B * H * W, C), (B, H, W)
    else:
        cols, (OB, OH, OW) = _im2col_3x3(x_nhwc, stride)
    y = gemm_bias_act(cols, w_flat, b, act)
    return y.reshape(OB, OH, OW, -1)


# ---------------------------------------------------------------------------
# Model definition (mnist config: in_channels=1, img=28, classes=10).
# BatchNorm (eval mode) is folded into the preceding conv's weight/bias.
# ---------------------------------------------------------------------------
def _features_cfg(in_ch):
    cfg = [dict(ksize=3, stride=2, cin=in_ch, cout=32, act="relu6")]   # stem
    blocks = [(32, 16, 1, 1), (16, 24, 2, 6), (24, 32, 2, 6), (32, 64, 2, 6),
              (64, 96, 1, 6), (96, 160, 2, 6), (160, 320, 1, 6)]
    spans = []
    for cin, cout, s, e in blocks:
        hidden = cin * e
        layers = []
        if e != 1:
            # NOTE: this model's "expansion" ConvBNReLU is a 3x3, pad-1 conv (per the spec).
            layers.append(dict(ksize=3, stride=1, cin=cin, cout=hidden, act="relu6"))
        layers.append(dict(ksize=3, stride=s, cin=hidden, cout=hidden, act="relu6"))
        layers.append(dict(ksize=1, stride=1, cin=hidden, cout=cout, act="none"))
        spans.append((len(cfg), len(cfg) + len(layers), s == 1 and cin == cout))
        cfg.extend(layers)
    cfg.append(dict(ksize=1, stride=1, cin=320, cout=1280, act="relu6"))  # head conv
    return cfg, spans


def _conv_bn_params(key, cin, cout, ksize):
    kw_, kg, kb, km, kv = jax.random.split(key, 5)
    fan_in = cin * ksize * ksize
    bound = 1.0 / jnp.sqrt(fan_in)
    w = jax.random.uniform(kw_, (ksize * ksize * cin, cout), jnp.float32, -bound, bound)
    gamma = jax.random.uniform(kg, (cout,), jnp.float32, 0.5, 1.5)
    beta = jax.random.uniform(kb, (cout,), jnp.float32, -0.1, 0.1)
    mean = 0.1 * jax.random.normal(km, (cout,), jnp.float32)
    var = jax.random.uniform(kv, (cout,), jnp.float32, 0.5, 1.5)
    scale = gamma / jnp.sqrt(var + 1e-5)          # eval-mode BN folded into conv
    w_f = (w * scale[None, :]).astype(jnp.bfloat16)
    b_f = (beta - mean * scale).reshape(1, cout)
    return w_f, b_f


def _linear_params(key, cin, cout):
    kw_, kb = jax.random.split(key)
    bound = 1.0 / jnp.sqrt(cin)
    w = jax.random.uniform(kw_, (cin, cout), jnp.float32, -bound, bound).astype(jnp.bfloat16)
    b = jax.random.uniform(kb, (1, cout), jnp.float32, -bound, bound)
    return w, b


def init_params(key, in_ch=1, num_classes=10):
    cfg, spans = _features_cfg(in_ch)
    keys = jax.random.split(key, len(cfg) + 3)
    conv = [_conv_bn_params(keys[i], c["cin"], c["cout"], c["ksize"])
            for i, c in enumerate(cfg)]
    fc1_w, fc1_b = _linear_params(keys[len(cfg)], 1280, 640)
    fc2_w, fc2_b = _linear_params(keys[len(cfg) + 1], 640, 320)
    cls_w, cls_b = _linear_params(keys[len(cfg) + 2], 320, num_classes)
    return dict(cfg=cfg, spans=spans, conv=conv,
                fc1_w=fc1_w, fc1_b=fc1_b, fc2_w=fc2_w, fc2_b=fc2_b,
                cls_w=cls_w, cls_b=cls_b)


def mobilenetv2_forward(params, x_nchw):
    cfg, spans, conv = params["cfg"], params["spans"], params["conv"]
    x = jnp.transpose(x_nchw, (0, 2, 3, 1)).astype(jnp.float32)   # NCHW -> NHWC

    # features
    c = cfg[0]
    x = conv2d_bn_act(x, *conv[0], ksize=c["ksize"], stride=c["stride"], act=c["act"])
    for (start, end, use_res) in spans:
        inp = x
        for j in range(start, end):
            c = cfg[j]
            x = conv2d_bn_act(x, *conv[j], ksize=c["ksize"], stride=c["stride"], act=c["act"])
        if use_res:                    # never taken for this config; kept for faithfulness
            x = x + inp
    c = cfg[-1]
    x = conv2d_bn_act(x, *conv[-1], ksize=c["ksize"], stride=c["stride"], act=c["act"])

    x1 = jnp.transpose(x, (0, 3, 1, 2))            # [B, 1280, 1, 1], torch NCHW layout
    pooled = jnp.mean(x, axis=(1, 2))              # AdaptiveAvgPool2d(1) + Flatten (1x1 spatial)
    x2 = gemm_bias_act(pooled, params["fc1_w"], params["fc1_b"], "relu")
    x3 = gemm_bias_act(x2, params["fc2_w"], params["fc2_b"], "relu")
    x4 = gemm_bias_act(x3, params["cls_w"], params["cls_b"], "none")
    return [x1, x2, x3, x4]


# ---------------------------------------------------------------------------
# Pure-JAX reference (lax.conv) for correctness verification.
# ---------------------------------------------------------------------------
def reference_forward(params, x_nchw):
    cfg, spans, conv = params["cfg"], params["spans"], params["conv"]
    x = jnp.transpose(x_nchw, (0, 2, 3, 1)).astype(jnp.float32)

    def conv_ref(x, w_flat, b, ksize, stride, act):
        cin, cout = x.shape[-1], w_flat.shape[-1]
        w = w_flat.astype(jnp.float32).reshape(ksize, ksize, cin, cout)
        pad = 1 if ksize == 3 else 0
        y = jax.lax.conv_general_dilated(
            x, w, window_strides=(stride, stride),
            padding=[(pad, pad), (pad, pad)],
            dimension_numbers=("NHWC", "HWIO", "NHWC"),
            precision=jax.lax.Precision.HIGHEST)
        y = y + b.reshape(1, 1, 1, -1)
        if act == "relu":
            y = jnp.maximum(y, 0.0)
        elif act == "relu6":
            y = jnp.clip(y, 0.0, 6.0)
        return y

    def lin(v, w, b, act):
        y = jnp.dot(v, w.astype(jnp.float32),
                    precision=jax.lax.Precision.HIGHEST) + b
        return jnp.maximum(y, 0.0) if act == "relu" else y

    c = cfg[0]
    x = conv_ref(x, *conv[0], c["ksize"], c["stride"], c["act"])
    for (start, end, use_res) in spans:
        inp = x
        for j in range(start, end):
            c = cfg[j]
            x = conv_ref(x, *conv[j], c["ksize"], c["stride"], c["act"])
        if use_res:
            x = x + inp
    c = cfg[-1]
    x = conv_ref(x, *conv[-1], c["ksize"], c["stride"], c["act"])

    x1 = jnp.transpose(x, (0, 3, 1, 2))
    pooled = jnp.mean(x, axis=(1, 2))
    x2 = lin(pooled, params["fc1_w"], params["fc1_b"], "relu")
    x3 = lin(x2, params["fc2_w"], params["fc2_b"], "relu")
    x4 = lin(x3, params["cls_w"], params["cls_b"], "none")
    return [x1, x2, x3, x4]


if __name__ == "__main__":
    key = jax.random.PRNGKey(0)
    kx, kp = jax.random.split(key)

    # MNIST config of the original module: (in_channels, img_size, classes) = (1, 28, 10).
    x = jax.random.normal(kx, (2, 1, 28, 28), jnp.float32)
    params = init_params(kp, in_ch=1, num_classes=10)

    outs = mobilenetv2_forward(params, x)
    outs = jax.block_until_ready(outs)

    assert outs[0].shape == (2, 1280, 1, 1)
    assert outs[1].shape == (2, 640)
    assert outs[2].shape == (2, 320)
    assert outs[3].shape == (2, 10)

    refs = reference_forward(params, x)
    for name, o, r in zip(["x1", "x2", "x3", "x4"], outs, refs):
        err = float(jnp.max(jnp.abs(o - r)))
        assert jnp.allclose(o, r, atol=3e-3, rtol=3e-3), (name, err)

    print("KERNEL_OK")
</pallas_src>

<mosaic_0001>
module attributes {stable_mosaic.version = 11 : i64} {
  func.func @_gemm_kernel(%arg0: i32, %arg1: i32, %arg2: memref<392x128xf32, #tpu.memory_space<vmem>>, %arg3: memref<128x128xbf16, #tpu.memory_space<vmem>>, %arg4: memref<1x128xf32, #tpu.memory_space<vmem>>, %arg5: memref<392x128xf32, #tpu.memory_space<vmem>>, %arg6: memref<392x128xf32, #tpu.memory_space<vmem>>) attributes {dimension_semantics = [#tpu.dimension_semantics<parallel>, #tpu.dimension_semantics<arbitrary>], iteration_bounds = array<i64: 1, 1>, scalar_prefetch = 0 : i64, scratch_operands = 1 : i64, tpu.core_type = #tpu.core_type<tc>, window_params = [{transform_indices = @transform_0, window_bounds = array<i64: 392, 128>}, {transform_indices = @transform_1, window_bounds = array<i64: 128, 128>}, {pipeline_mode = #tpu.pipeline_mode<synchronous>, transform_indices = @transform_2, window_bounds = array<i64: 1, 128>}, {transform_indices = @transform_3, window_bounds = array<i64: 392, 128>}]} {
    %c0_i32 = arith.constant 0 : i32
    %0 = arith.cmpi eq, %arg1, %c0_i32 : i32
    %1 = arith.extui %0 : i1 to i32
    %c0_i32_0 = arith.constant 0 : i32
    %2 = arith.cmpi ne, %1, %c0_i32_0 : i32
    scf.if %2 {
      %c0_10 = arith.constant 0 : index
      %c0_11 = arith.constant 0 : index
      %13 = vector.load %arg4[%c0_10, %c0_11] : memref<1x128xf32, #tpu.memory_space<vmem>>, vector<1x128xf32>
      %14 = vector.shape_cast %13 : vector<1x128xf32> to vector<1x128xf32>
      %15 = vector.broadcast %14 : vector<1x128xf32> to vector<392x128xf32>
      %c0_12 = arith.constant 0 : index
      %c0_13 = arith.constant 0 : index
      %16 = vector.load %arg6[%c0_12, %c0_13] : memref<392x128xf32, #tpu.memory_space<vmem>>, vector<392x128xf32>
      tpu.vector_store %arg6[%c0_12, %c0_13], %15 {strides = array<i32>} : memref<392x128xf32, #tpu.memory_space<vmem>>, vector<392x128xf32>,
    } else {
    }
    %c0 = arith.constant 0 : index
    %c0_1 = arith.constant 0 : index
    %3 = vector.load %arg6[%c0, %c0_1] : memref<392x128xf32, #tpu.memory_space<vmem>>, vector<392x128xf32>
    %c0_2 = arith.constant 0 : index
    %c0_3 = arith.constant 0 : index
    %4 = vector.load %arg2[%c0_2, %c0_3] : memref<392x128xf32, #tpu.memory_space<vmem>>, vector<392x128xf32>
    %c0_4 = arith.constant 0 : index
    %c0_5 = arith.constant 0 : index
    %5 = vector.load %arg3[%c0_4, %c0_5] : memref<128x128xbf16, #tpu.memory_space<vmem>>, vector<128x128xbf16>
    %6 = arith.extf %5 : vector<128x128xbf16> to vector<128x128xf32>
    %cst = arith.constant dense<0.000000e+00> : vector<392x128xf32>
    %7 = tpu.matmul %4, %6, %cst {dimension_numbers = #tpu.dot_dimension_numbers<[1], [0], [0], [1], [0, 0, 1, 1], [], []>} : vector<392x128xf32>, vector<128x128xf32>, vector<392x128xf32> -> vector<392x128xf32>
    %8 = arith.addf %3, %7 : vector<392x128xf32>
    %c0_6 = arith.constant 0 : index
    %c0_7 = arith.constant 0 : index
    %9 = vector.load %arg6[%c0_6, %c0_7] : memref<392x128xf32, #tpu.memory_space<vmem>>, vector<392x128xf32>
    tpu.vector_store %arg6[%c0_6, %c0_7], %8 {strides = array<i32>} : memref<392x128xf32, #tpu.memory_space<vmem>>, vector<392x128xf32>,
    %c0_i32_8 = arith.constant 0 : i32
    %10 = arith.cmpi eq, %arg1, %c0_i32_8 : i32
    %11 = arith.extui %10 : i1 to i32
    %c0_i32_9 = arith.constant 0 : i32
    %12 = arith.cmpi ne, %11, %c0_i32_9 : i32
    scf.if %12 {
      %c0_10 = arith.constant 0 : index
      %c0_11 = arith.constant 0 : index
      %13 = vector.load %arg6[%c0_10, %c0_11] : memref<392x128xf32, #tpu.memory_space<vmem>>, vector<392x128xf32>
      %cst_12 = arith.constant 0.000000e+00 : f32
      %cst_13 = arith.constant 6.000000e+00 : f32
      %14 = vector.broadcast %cst_12 : f32 to vector<392x128xf32>
      %15 = arith.maximumf %14, %13 : vector<392x128xf32>
      %16 = vector.broadcast %cst_13 : f32 to vector<392x128xf32>
      %17 = arith.minimumf %16, %15 : vector<392x128xf32>
      %c0_14 = arith.constant 0 : index
      %c0_15 = arith.constant 0 : index
      %18 = vector.load %arg5[%c0_14, %c0_15] : memref<392x128xf32, #tpu.memory_space<vmem>>, vector<392x128xf32>
      tpu.vector_store %arg5[%c0_14, %c0_15], %17 {strides = array<i32>} : memref<392x128xf32, #tpu.memory_space<vmem>>, vector<392x128xf32>,
    } else {
    }
    return
  }
  func.func @transform_0(%arg0: i32, %arg1: i32) -> (i32, i32) {
    %c0_i32 = arith.constant 0 : i32
    return %arg0, %arg1 : i32, i32
  }
  func.func @transform_1(%arg0: i32, %arg1: i32) -> (i32, i32) {
    %c0_i32 = arith.constant 0 : i32
    %c0_i32_0 = arith.constant 0 : i32
    return %arg1, %c0_i32 : i32, i32
  }
  func.func @transform_2(%arg0: i32, %arg1: i32) -> (i32, i32) {
    %c0_i32 = arith.constant 0 : i32
    %c0_i32_0 = arith.constant 0 : i32
    %c0_i32_1 = arith.constant 0 : i32
    return %c0_i32, %c0_i32_0 : i32, i32
  }
  func.func @transform_3(%arg0: i32, %arg1: i32) -> (i32, i32) {
    %c0_i32 = arith.constant 0 : i32
    %c0_i32_0 = arith.constant 0 : i32
    return %arg0, %c0_i32 : i32, i32
  }
}

</mosaic_0001>

<bundles_post_ra>
// kernel: tpu_custom_call.1
= control target key start
LH: loop header
LB: loop body
LE: loop exit
PB: predicated region body
PF: predicated region fallthrough
CT: control target
= control target key end

     0   :  { %8 = vsyncpa [#allocation4], 0  ;;  %s1477_s0 = inlined_call_operand.hbm [shape: f32[392,128], index: 0, kind: input, shape index: {}]   ;;  %s1478_s1 = inlined_call_operand.hbm [shape: bf16[128,128], index: 1, kind: input, shape index: {}]   ;;  %s1479_s2 = inlined_call_operand.vmem [shape: f32[1,128], index: 2, kind: input, shape index: {}]   ;;  %s1480_s3 = inlined_call_operand.hbm [shape: f32[392,128], index: 3, kind: output, shape index: {}]  }
   0x1   :  { %9 = vsyncpa [#allocation7], 0 }
   0x2   :  { %10 = vsyncpa [#allocation5], 0  ;;  %s1249_s12 = smov [#allocation3]  }
   0x3   :  { %s16_s13 = sshll.u32 %s1249_s12, 4  ;;  %s17_s13 = int_to_ptr.vmem [resolvable:$true] %s16_s13 }
   0x4   :  { %s1191_s14 = scalar_lea.vmem %s17_s13, 6272  ;;  %p1196_p1 = scmp.lt.s32.totalorder %s17_s13, %s17_s13 }
   0x5   :  { %p1192_p0 = scmp.ne.s32.totalorder %s17_s13, %s1191_s14  ;;  %p1197_p2 = scmp.lt.s32.totalorder %s1191_s14, %s1191_s14 }
   0x7   :  { %p1198_p3 = por %p1197_p2, %p1196_p1 }
   0x9   :  { %p1199_p4 = pnand %p1198_p3, %p1192_p0 }
   0xb   :  { %1202 = shalt.err (!%p1199_p4)
}
   0xc   :  { %s1250_s15 = smov 128   ;;  %s1251_s16 = smov 8  }
   0xd   :  { %22 = dma.hbm_to_vmem [thread:$0]  %s1477_s0, 6272, %s17_s13, [#allocation4], %s1250_s15, %s1250_s15, %s1251_s16  }
   0xe   :  { %s1252_s19 = smov [#allocation6]  }
   0xf   :  { %s28_s20 = sshll.u32 %s1252_s19, 4  ;;  %s29_s20 = int_to_ptr.vmem [resolvable:$true] %s28_s20 }
  0x10   :  { %s1211_s21 = scalar_lea.vmem %s29_s20, 1024  ;;  %p1216_p6 = scmp.lt.s32.totalorder %s29_s20, %s29_s20 }
  0x11   :  { %p1212_p5 = scmp.ne.s32.totalorder %s29_s20, %s1211_s21  ;;  %p1217_p7 = scmp.lt.s32.totalorder %s1211_s21, %s1211_s21 }
  0x13   :  { %p1218_p8 = por %p1217_p7, %p1216_p6 }
  0x15   :  { %p1219_p9 = pnand %p1218_p8, %p1212_p5 }
  0x17   :  { %1222 = shalt.err (!%p1219_p9)
}
  0x18   :  { %s1253_s22 = smov 64   ;;  %s1254_s23 = smov 4  }
  0x19   :  { %34 = dma.hbm_to_vmem [thread:$0]  %s1478_s1, 1024, %s29_s20, [#allocation7], %s1253_s22, %s1253_s22, %s1254_s23  }
  0x1a   :  { %1243 = dma.done.wait [#allocation4], 6272  }
  0x1b   :  { %1244 = vsyncadd [#allocation4], 4294961024 }
  0x1c   :  { %1245 = dma.done.wait [#allocation7], 1024  }
  0x1d   :  { %1246 = vsyncadd [#allocation7], 4294966272  ;;  %v1255_v0 = vmov 0.0   ;;  %vm1256_vm0 = vmmov 0   ;;  %v897_v1 = vld [vmem:[#allocation6 + $0x38] sm:$0xff]   ;;  %v896_v2 = vld [vmem:[#allocation6 + $0x30] sm:$0xff]  }
  0x1e   :  { %963 = vmatprep.subr.mxu0 %v1255_v0  ;;  %1142 = vmatprep.subr.mxu1 %v1255_v0  ;;  %v889_v3 = vunpack.c.l.bf16 %v897_v1  ;;  %v890_v4 = vunpack.c.h.bf16 %v897_v1  ;;  %v886_v5 = vunpack.c.h.bf16 %v896_v2  ;;  %v895_v6 = vld [vmem:[#allocation6 + $0x28] sm:$0xff]   ;;  %v885_v7 = vunpack.c.l.bf16 %v896_v2  ;;  %v894_v9 = vld [vmem:[#allocation6 + $0x20] sm:$0xff]   ;;  %v893_v12 = vld [vmem:[#allocation6 + $0x18] sm:$0xff]  }
  0x1f   :  { %995 = vmatprep.mubr.msk.f32.mxu0 %vm1256_vm0, %v1255_v0  ;;  %1070 = vmatprep.mubr.msk.f32.mxu1 %vm1256_vm0, %v1255_v0  ;;  %v882_v8 = vunpack.c.h.bf16 %v895_v6  ;;  %v881_v10 = vunpack.c.l.bf16 %v895_v6  ;;  %v878_v11 = vunpack.c.h.bf16 %v894_v9  ;;  %v877_v13 = vunpack.c.l.bf16 %v894_v9  ;;  %v892_v15 = vld [vmem:[#allocation6 + $0x10] sm:$0xff]   ;;  %v891_v18 = vld [vmem:[#allocation6 + $0x8] sm:$0xff]   ;;  %v860_v21 = vld [vmem:[#allocation6] sm:$0xff]  }
  0x20   :  { %964 = vmatpush3.msra.mxu0 %v890_v4  ;;  %1158 = vmatpush3.msra.mxu1 %v890_v4  ;;  %v874_v14 = vunpack.c.h.bf16 %v893_v12  ;;  %v873_v16 = vunpack.c.l.bf16 %v893_v12  ;;  %v870_v17 = vunpack.c.h.bf16 %v892_v15  ;;  %v869_v19 = vunpack.c.l.bf16 %v892_v15  ;;  %v152_v25 = vld [vmem:[#allocation3] sm:$0xff]  ;;  %v177_v26 = vld [vmem:[#allocation3 + $0xc8] sm:$0xff]  ;;  %v178_v28 = vld [vmem:[#allocation3 + $0xd0] sm:$0xff] }
  0x21   :  { %965 = vmatprep.subr.mxu0 %v1255_v0  ;;  %1143 = vmatprep.subr.mxu1 %v1255_v0  ;;  %v866_v20 = vunpack.c.h.bf16 %v891_v18  ;;  %v865_v22 = vunpack.c.l.bf16 %v891_v18  ;;  %v862_v23 = vunpack.c.h.bf16 %v860_v21  ;;  %v861_v24 = vunpack.c.l.bf16 %v860_v21  ;;  %v153_v27 = vld [vmem:[#allocation3 + $0x8] sm:$0xff]  ;;  %v154_v29 = vld [vmem:[#allocation3 + $0x10] sm:$0xff]  ;;  %v179_v30 = vld [vmem:[#allocation3 + $0xd8] sm:$0xff] }
  0x22   :  { %966 = vmatpush3.msra.mxu0 %v889_v3  ;;  %1159 = vmatpush3.msra.mxu1 %v889_v3  ;;  %v155_v31 = vld [vmem:[#allocation3 + $0x18] sm:$0xff]  ;;  %v180_v32 = vld [vmem:[#allocation3 + $0xe0] sm:$0xff]  ;;  %v181_v34 = vld [vmem:[#allocation3 + $0xe8] sm:$0xff] }
  0x23   :  { %967 = vmatprep.subr.mxu0 %v1255_v0  ;;  %1144 = vmatprep.subr.mxu1 %v1255_v0  ;;  %v156_v33 = vld [vmem:[#allocation3 + $0x20] sm:$0xff]  ;;  %v157_v35 = vld [vmem:[#allocation3 + $0x28] sm:$0xff]  ;;  %v182_v36 = vld [vmem:[#allocation3 + $0xf0] sm:$0xff] }
  0x24   :  { %968 = vmatpush3.msra.mxu0 %v886_v5  ;;  %1160 = vmatpush3.msra.mxu1 %v886_v5  ;;  %v158_v37 = vld [vmem:[#allocation3 + $0x30] sm:$0xff]  ;;  %v183_v38 = vld [vmem:[#allocation3 + $0xf8] sm:$0xff]  ;;  %v184_v40 = vld [vmem:[#allocation3 + $0x100] sm:$0xff] }
  0x25   :  { %969 = vmatprep.subr.mxu0 %v1255_v0  ;;  %1145 = vmatprep.subr.mxu1 %v1255_v0  ;;  %v159_v39 = vld [vmem:[#allocation3 + $0x38] sm:$0xff]  ;;  %v160_v41 = vld [vmem:[#allocation3 + $0x40] sm:$0xff]  ;;  %v185_v42 = vld [vmem:[#allocation3 + $0x108] sm:$0xff] }
  0x26   :  { %970 = vmatpush3.msra.mxu0 %v885_v7  ;;  %1161 = vmatpush3.msra.mxu1 %v885_v7  ;;  %v161_v43 = vld [vmem:[#allocation3 + $0x48] sm:$0xff]  ;;  %v186_v44 = vld [vmem:[#allocation3 + $0x110] sm:$0xff]  ;;  %v187_v46 = vld [vmem:[#allocation3 + $0x118] sm:$0xff] }
  0x27   :  { %971 = vmatprep.subr.mxu0 %v1255_v0  ;;  %1146 = vmatprep.subr.mxu1 %v1255_v0  ;;  %v162_v45 = vld [vmem:[#allocation3 + $0x50] sm:$0xff]  ;;  %v163_v47 = vld [vmem:[#allocation3 + $0x58] sm:$0xff]  ;;  %v188_v48 = vld [vmem:[#allocation3 + $0x120] sm:$0xff] }
  0x28   :  { %972 = vmatpush3.msra.mxu0 %v882_v8  ;;  %1162 = vmatpush3.msra.mxu1 %v882_v8  ;;  %v164_v49 = vld [vmem:[#allocation3 + $0x60] sm:$0xff]  ;;  %v189_v50 = vld [vmem:[#allocation3 + $0x128] sm:$0xff]  ;;  %v190_v52 = vld [vmem:[#allocation3 + $0x130] sm:$0xff] }
  0x29   :  { %973 = vmatprep.subr.mxu0 %v1255_v0  ;;  %1147 = vmatprep.subr.mxu1 %v1255_v0  ;;  %v165_v51 = vld [vmem:[#allocation3 + $0x68] sm:$0xff]  ;;  %v166_v53 = vld [vmem:[#allocation3 + $0x70] sm:$0xff]  ;;  %v191_v54 = vld [vmem:[#allocation3 + $0x138] sm:$0xff] }
  0x2a   :  { %974 = vmatpush3.msra.mxu0 %v881_v10  ;;  %1163 = vmatpush3.msra.mxu1 %v881_v10  ;;  %v167_v55 = vld [vmem:[#allocation3 + $0x78] sm:$0xff]  ;;  %v192_v56 = vld [vmem:[#allocation3 + $0x140] sm:$0xff]  ;;  %v193_v58 = vld [vmem:[#allocation3 + $0x148] sm:$0xff] }
  0x2b   :  { %975 = vmatprep.subr.mxu0 %v1255_v0  ;;  %1148 = vmatprep.subr.mxu1 %v1255_v0  ;;  %v168_v57 = vld [vmem:[#allocation3 + $0x80] sm:$0xff]  ;;  %v169_v59 = vld [vmem:[#allocation3 + $0x88] sm:$0xff]  ;;  %v194_v60 = vld [vmem:[#allocation3 + $0x150] sm:$0xff] }
  0x2c   :  { %976 = vmatpush3.msra.mxu0 %v878_v11  ;;  %1164 = vmatpush3.msra.mxu1 %v878_v11  ;;  %v170_v61 = vld [vmem:[#allocation3 + $0x90] sm:$0xff]  ;;  %v195_v62 = vld [vmem:[#allocation3 + $0x158] sm:$0xff]  ;;  %v196_v1 = vld [vmem:[#allocation3 + $0x160] sm:$0xff] }
  0x2d   :  { %977 = vmatprep.subr.mxu0 %v1255_v0  ;;  %1149 = vmatprep.subr.mxu1 %v1255_v0  ;;  %v171_v63 = vld [vmem:[#allocation3 + $0x98] sm:$0xff]  ;;  %v172_v2 = vld [vmem:[#allocation3 + $0xa0] sm:$0xff]  ;;  %v197_v3 = vld [vmem:[#allocation3 + $0x168] sm:$0xff] }
  0x2e   :  { %978 = vmatpush3.msra.mxu0 %v877_v13  ;;  %1165 = vmatpush3.msra.mxu1 %v877_v13  ;;  %v173_v4 = vld [vmem:[#allocation3 + $0xa8] sm:$0xff]  ;;  %v198_v5 = vld [vmem:[#allocation3 + $0x170] sm:$0xff]  ;;  %v199_v7 = vld [vmem:[#allocation3 + $0x178] sm:$0xff] }
  0x2f   :  { %979 = vmatprep.subr.mxu0 %v1255_v0  ;;  %1150 = vmatprep.subr.mxu1 %v1255_v0  ;;  %v174_v6 = vld [vmem:[#allocation3 + $0xb0] sm:$0xff]  ;;  %v175_v8 = vld [vmem:[#allocation3 + $0xb8] sm:$0xff]  ;;  %v200_v9 = vld [vmem:[#allocation3 + $0x180] sm:$0xff] }
  0x30   :  { %980 = vmatpush3.msra.mxu0 %v874_v14  ;;  %1166 = vmatpush3.msra.mxu1 %v874_v14  ;;  %v176_v10 = vld [vmem:[#allocation3 + $0xc0] sm:$0xff] }
  0x31   :  { %981 = vmatprep.subr.mxu0 %v1255_v0  ;;  %1151 = vmatprep.subr.mxu1 %v1255_v0  ;;  %v1420_v11 = vld [vmem:[%s1479_s2] ss:$0 sm:$0xff]  ;;  %s1257_s2 = smov [#allocation8]  }
  0x32   :  { %982 = vmatpush3.msra.mxu0 %v873_v16  ;;  %1167 = vmatpush3.msra.mxu1 %v873_v16  ;;  %s845_s26 = sshll.u32 %s1257_s2, 4  ;;  %s846_s26 = int_to_ptr.vmem [resolvable:$true] %s845_s26 }
  0x33   :  { %983 = vmatprep.subr.mxu0 %v1255_v0  ;;  %1152 = vmatprep.subr.mxu1 %v1255_v0  ;;  %s1223_s27 = scalar_lea.vmem %s846_s26, 6272  ;;  %p1228_p11 = scmp.lt.s32.totalorder %s846_s26, %s846_s26 }
  0x34   :  { %984 = vmatpush3.msra.mxu0 %v870_v17  ;;  %1168 = vmatpush3.msra.mxu1 %v870_v17  ;;  %p1224_p10 = scmp.ne.s32.totalorder %s846_s26, %s1223_s27  ;;  %p1229_p12 = scmp.lt.s32.totalorder %s1223_s27, %s1223_s27 }
  0x35   :  { %985 = vmatprep.subr.mxu0 %v1255_v0  ;;  %1153 = vmatprep.subr.mxu1 %v1255_v0 }
  0x36   :  { %986 = vmatpush3.msra.mxu0 %v869_v19  ;;  %1169 = vmatpush3.msra.mxu1 %v869_v19  ;;  %p1230_p13 = por %p1229_p12, %p1228_p11 }
  0x37   :  { %987 = vmatprep.subr.mxu0 %v1255_v0  ;;  %1154 = vmatprep.subr.mxu1 %v1255_v0 }
  0x38   :  { %988 = vmatpush3.msra.mxu0 %v866_v20  ;;  %1170 = vmatpush3.msra.mxu1 %v866_v20  ;;  %p1231_p0 = pnand %p1230_p13, %p1224_p10 }
  0x39   :  { %989 = vmatprep.subr.mxu0 %v1255_v0  ;;  %1155 = vmatprep.subr.mxu1 %v1255_v0 }
  0x3a   :  { %990 = vmatpush3.msra.mxu0 %v865_v22  ;;  %1171 = vmatpush3.msra.mxu1 %v865_v22 }
  0x3b   :  { %991 = vmatprep.subr.mxu0 %v1255_v0  ;;  %1156 = vmatprep.subr.mxu1 %v1255_v0 }
  0x3c   :  { %992 = vmatpush3.msra.mxu0 %v862_v23  ;;  %1172 = vmatpush3.msra.mxu1 %v862_v23 }
  0x3d   :  { %993 = vmatprep.subr.mxu0 %v1255_v0  ;;  %1157 = vmatprep.subr.mxu1 %v1255_v0 }
  0x3e   :  { %994 = vmatpush3.msra.mxu0 %v861_v24  ;;  %1173 = vmatpush3.msra.mxu1 %v861_v24 }
  0x3f   :  { %996 = vmatmul.mubr.f32.vlgmr.msra.gmra.mxu0 %v152_v25  ;;  %1071 = vmatmul.mubr.f32.vlgmr.msra.gmra.mxu1 %v177_v26 }
  0x40   :  { %998 = vmatprep.mubr.msk.f32.mxu0 %vm1256_vm0, %v1255_v0  ;;  %1073 = vmatprep.mubr.msk.f32.mxu1 %vm1256_vm0, %v1255_v0 }
  0x43   :  { %999 = vmatmul.mubr.f32.gmra.mxu0 %v153_v27  ;;  %1074 = vmatmul.mubr.f32.gmra.mxu1 %v178_v28 }
  0x44   :  { %1001 = vmatprep.mubr.msk.f32.mxu0 %vm1256_vm0, %v1255_v0  ;;  %1076 = vmatprep.mubr.msk.f32.mxu1 %vm1256_vm0, %v1255_v0 }
  0x47   :  { %1002 = vmatmul.mubr.f32.gmra.mxu0 %v154_v29  ;;  %1077 = vmatmul.mubr.f32.gmra.mxu1 %v179_v30 }
  0x48   :  { %1004 = vmatprep.mubr.msk.f32.mxu0 %vm1256_vm0, %v1255_v0  ;;  %1079 = vmatprep.mubr.msk.f32.mxu1 %vm1256_vm0, %v1255_v0 }
  0x4b   :  { %1005 = vmatmul.mubr.f32.gmra.mxu0 %v155_v31  ;;  %1080 = vmatmul.mubr.f32.gmra.mxu1 %v180_v32 }
  0x4c   :  { %1007 = vmatprep.mubr.msk.f32.mxu0 %vm1256_vm0, %v1255_v0  ;;  %1082 = vmatprep.mubr.msk.f32.mxu1 %vm1256_vm0, %v1255_v0 }
  0x4f   :  { %1008 = vmatmul.mubr.f32.gmra.mxu0 %v156_v33  ;;  %1083 = vmatmul.mubr.f32.gmra.mxu1 %v181_v34 }
  0x50   :  { %1010 = vmatprep.mubr.msk.f32.mxu0 %vm1256_vm0, %v1255_v0  ;;  %1085 = vmatprep.mubr.msk.f32.mxu1 %vm1256_vm0, %v1255_v0 }
  0x53   :  { %1011 = vmatmul.mubr.f32.gmra.mxu0 %v157_v35  ;;  %1086 = vmatmul.mubr.f32.gmra.mxu1 %v182_v36 }
  0x54   :  { %1013 = vmatprep.mubr.msk.f32.mxu0 %vm1256_vm0, %v1255_v0  ;;  %1088 = vmatprep.mubr.msk.f32.mxu1 %vm1256_vm0, %v1255_v0 }
  0x57   :  { %1014 = vmatmul.mubr.f32.gmra.mxu0 %v158_v37  ;;  %1089 = vmatmul.mubr.f32.gmra.mxu1 %v183_v38 }
  0x58   :  { %1016 = vmatprep.mubr.msk.f32.mxu0 %vm1256_vm0, %v1255_v0  ;;  %1091 = vmatprep.mubr.msk.f32.mxu1 %vm1256_vm0, %v1255_v0 }
  0x5b   :  { %1017 = vmatmul.mubr.f32.gmra.mxu0 %v159_v39  ;;  %1092 = vmatmul.mubr.f32.gmra.mxu1 %v184_v40 }
  0x5c   :  { %1019 = vmatprep.mubr.msk.f32.mxu0 %vm1256_vm0, %v1255_v0  ;;  %1094 = vmatprep.mubr.msk.f32.mxu1 %vm1256_vm0, %v1255_v0 }
  0x5f   :  { %1020 = vmatmul.mubr.f32.gmra.mxu0 %v160_v41  ;;  %1095 = vmatmul.mubr.f32.gmra.mxu1 %v185_v42 }
  0x60   :  { %1022 = vmatprep.mubr.msk.f32.mxu0 %vm1256_vm0, %v1255_v0  ;;  %1097 = vmatprep.mubr.msk.f32.mxu1 %vm1256_vm0, %v1255_v0 }
  0x63   :  { %1023 = vmatmul.mubr.f32.gmra.mxu0 %v161_v43  ;;  %1098 = vmatmul.mubr.f32.gmra.mxu1 %v186_v44 }
  0x64   :  { %1025 = vmatprep.mubr.msk.f32.mxu0 %vm1256_vm0, %v1255_v0  ;;  %1100 = vmatprep.mubr.msk.f32.mxu1 %vm1256_vm0, %v1255_v0 }
  0x67   :  { %1026 = vmatmul.mubr.f32.gmra.mxu0 %v162_v45  ;;  %1101 = vmatmul.mubr.f32.gmra.mxu1 %v187_v46 }
  0x68   :  { %1028 = vmatprep.mubr.msk.f32.mxu0 %vm1256_vm0, %v1255_v0  ;;  %1103 = vmatprep.mubr.msk.f32.mxu1 %vm1256_vm0, %v1255_v0 }
  0x6b   :  { %1029 = vmatmul.mubr.f32.gmra.mxu0 %v163_v47  ;;  %1104 = vmatmul.mubr.f32.gmra.mxu1 %v188_v48 }
  0x6c   :  { %1031 = vmatprep.mubr.msk.f32.mxu0 %vm1256_vm0, %v1255_v0  ;;  %1106 = vmatprep.mubr.msk.f32.mxu1 %vm1256_vm0, %v1255_v0 }
  0x6f   :  { %1032 = vmatmul.mubr.f32.gmra.mxu0 %v164_v49  ;;  %1107 = vmatmul.mubr.f32.gmra.mxu1 %v189_v50 }
  0x70   :  { %1034 = vmatprep.mubr.msk.f32.mxu0 %vm1256_vm0, %v1255_v0  ;;  %1109 = vmatprep.mubr.msk.f32.mxu1 %vm1256_vm0, %v1255_v0 }
  0x73   :  { %1035 = vmatmul.mubr.f32.gmra.mxu0 %v165_v51  ;;  %1110 = vmatmul.mubr.f32.gmra.mxu1 %v190_v52 }
  0x74   :  { %1037 = vmatprep.mubr.msk.f32.mxu0 %vm1256_vm0, %v1255_v0  ;;  %1112 = vmatprep.mubr.msk.f32.mxu1 %vm1256_vm0, %v1255_v0 }
  0x77   :  { %1038 = vmatmul.mubr.f32.gmra.mxu0 %v166_v53  ;;  %1113 = vmatmul.mubr.f32.gmra.mxu1 %v191_v54 }
  0x78   :  { %1040 = vmatprep.mubr.msk.f32.mxu0 %vm1256_vm0, %v1255_v0  ;;  %1115 = vmatprep.mubr.msk.f32.mxu1 %vm1256_vm0, %v1255_v0 }
  0x7b   :  { %1041 = vmatmul.mubr.f32.gmra.mxu0 %v167_v55  ;;  %1116 = vmatmul.mubr.f32.gmra.mxu1 %v192_v56 }
  0x7c   :  { %1043 = vmatprep.mubr.msk.f32.mxu0 %vm1256_vm0, %v1255_v0  ;;  %1118 = vmatprep.mubr.msk.f32.mxu1 %vm1256_vm0, %v1255_v0 }
  0x7f   :  { %1044 = vmatmul.mubr.f32.gmra.mxu0 %v168_v57  ;;  %1119 = vmatmul.mubr.f32.gmra.mxu1 %v193_v58 }
  0x80   :  { %1046 = vmatprep.mubr.msk.f32.mxu0 %vm1256_vm0, %v1255_v0  ;;  %1121 = vmatprep.mubr.msk.f32.mxu1 %vm1256_vm0, %v1255_v0 }
  0x83   :  { %1047 = vmatmul.mubr.f32.gmra.mxu0 %v169_v59  ;;  %1122 = vmatmul.mubr.f32.gmra.mxu1 %v194_v60 }
  0x84   :  { %1049 = vmatprep.mubr.msk.f32.mxu0 %vm1256_vm0, %v1255_v0  ;;  %1124 = vmatprep.mubr.msk.f32.mxu1 %vm1256_vm0, %v1255_v0 }
  0x87   :  { %1050 = vmatmul.mubr.f32.gmra.mxu0 %v170_v61  ;;  %1125 = vmatmul.mubr.f32.gmra.mxu1 %v195_v62 }
  0x88   :  { %1052 = vmatprep.mubr.msk.f32.mxu0 %vm1256_vm0, %v1255_v0  ;;  %1127 = vmatprep.mubr.msk.f32.mxu1 %vm1256_vm0, %v1255_v0 }
  0x8b   :  { %1053 = vmatmul.mubr.f32.gmra.mxu0 %v171_v63  ;;  %1128 = vmatmul.mubr.f32.gmra.mxu1 %v196_v1 }
  0x8c   :  { %1055 = vmatprep.mubr.msk.f32.mxu0 %vm1256_vm0, %v1255_v0  ;;  %1130 = vmatprep.mubr.msk.f32.mxu1 %vm1256_vm0, %v1255_v0 }
  0x8f   :  { %1056 = vmatmul.mubr.f32.gmra.mxu0 %v172_v2  ;;  %1131 = vmatmul.mubr.f32.gmra.mxu1 %v197_v3 }
  0x90   :  { %1058 = vmatprep.mubr.msk.f32.mxu0 %vm1256_vm0, %v1255_v0  ;;  %1133 = vmatprep.mubr.msk.f32.mxu1 %vm1256_vm0, %v1255_v0 }
  0x93   :  { %1059 = vmatmul.mubr.f32.gmra.mxu0 %v173_v4  ;;  %1134 = vmatmul.mubr.f32.gmra.mxu1 %v198_v5 }
  0x94   :  { %1061 = vmatprep.mubr.msk.f32.mxu0 %vm1256_vm0, %v1255_v0  ;;  %1136 = vmatprep.mubr.msk.f32.mxu1 %vm1256_vm0, %v1255_v0 }
  0x97   :  { %1062 = vmatmul.mubr.f32.gmra.mxu0 %v174_v6  ;;  %1137 = vmatmul.mubr.f32.gmra.mxu1 %v199_v7 }
  0x98   :  { %1064 = vmatprep.mubr.msk.f32.mxu0 %vm1256_vm0, %v1255_v0  ;;  %1139 = vmatprep.mubr.msk.f32.mxu1 %vm1256_vm0, %v1255_v0 }
  0x9b   :  { %1065 = vmatmul.mubr.f32.gmra.mxu0 %v175_v8  ;;  %1140 = vmatmul.mubr.f32.gmra.mxu1 %v200_v9 }
  0x9c   :  { %1067 = vmatprep.mubr.msk.f32.mxu0 %vm1256_vm0, %v1255_v0 }
  0x9f   :  { %1068 = vmatmul.mubr.f32.gmra.mxu0 %v176_v10 }
  0xff   :  { %v299_v12 = vpop.f32.mrf.mxu0  ;;  %v424_v13 = vpop.f32.mrf.mxu1 }
 0x100   :  { %v543_v14 = vadd.f32 %v1420_v11, %v299_v12  ;;  %v568_v15 = vadd.f32 %v1420_v11, %v424_v13 }
 0x101   :  { %v997_v16 = vpop.f32.mrf.mxu0  ;;  %v1072_v17 = vpop.f32.mrf.mxu1 }
 0x102   :  { %v693_v18 = vmax.f32 %v543_v14, 0.0  ;;  %v718_v19 = vmax.f32 %v568_v15, 0.0 }
 0x103   :  { %v304_v20 = vpop.f32.mrf.mxu0  ;;  %v429_v21 = vpop.f32.mrf.mxu1 }
 0x104   :  { %v742_v0 = vmin.f32 %v693_v18, 6.0  ;;  %v767_v22 = vmin.f32 %v718_v19, 6.0  ;;  %v544_v23 = vadd.f32 %v1420_v11, %v304_v20  ;;  %v569_v24 = vadd.f32 %v1420_v11, %v429_v21 }
 0x105   :  { %v1000_v25 = vpop.f32.mrf.mxu0  ;;  %v1075_v26 = vpop.f32.mrf.mxu1 }
 0x106   :  { %791 = vst [vmem:[#allocation8] sm:$0xff] %v742_v0  ;;  %816 = vst [vmem:[#allocation8 + $0xc8] sm:$0xff] %v767_v22  ;;  %v694_v27 = vmax.f32 %v544_v23, 0.0  ;;  %v719_v28 = vmax.f32 %v569_v24, 0.0 }
 0x107   :  { %v309_v29 = vpop.f32.mrf.mxu0  ;;  %v434_v30 = vpop.f32.mrf.mxu1 }
 0x108   :  { %v743_v31 = vmin.f32 %v694_v27, 6.0  ;;  %v768_v32 = vmin.f32 %v719_v28, 6.0  ;;  %v545_v33 = vadd.f32 %v1420_v11, %v309_v29  ;;  %v570_v34 = vadd.f32 %v1420_v11, %v434_v30 }
 0x109   :  { %v1003_v35 = vpop.f32.mrf.mxu0  ;;  %v1078_v36 = vpop.f32.mrf.mxu1 }
 0x10a   :  { %792 = vst [vmem:[#allocation8 + $0x8] sm:$0xff] %v743_v31  ;;  %817 = vst [vmem:[#allocation8 + $0xd0] sm:$0xff] %v768_v32  ;;  %v695_v37 = vmax.f32 %v545_v33, 0.0  ;;  %v720_v38 = vmax.f32 %v570_v34, 0.0 }
 0x10b   :  { %v314_v39 = vpop.f32.mrf.mxu0  ;;  %v439_v40 = vpop.f32.mrf.mxu1 }
 0x10c   :  { %v744_v41 = vmin.f32 %v695_v37, 6.0  ;;  %v769_v42 = vmin.f32 %v720_v38, 6.0  ;;  %v546_v43 = vadd.f32 %v1420_v11, %v314_v39  ;;  %v571_v44 = vadd.f32 %v1420_v11, %v439_v40 }
 0x10d   :  { %v1006_v45 = vpop.f32.mrf.mxu0  ;;  %v1081_v46 = vpop.f32.mrf.mxu1 }
 0x10e   :  { %793 = vst [vmem:[#allocation8 + $0x10] sm:$0xff] %v744_v41  ;;  %818 = vst [vmem:[#allocation8 + $0xd8] sm:$0xff] %v769_v42  ;;  %v696_v47 = vmax.f32 %v546_v43, 0.0  ;;  %v721_v48 = vmax.f32 %v571_v44, 0.0 }
 0x10f   :  { %v319_v49 = vpop.f32.mrf.mxu0  ;;  %v444_v50 = vpop.f32.mrf.mxu1 }
 0x110   :  { %v745_v51 = vmin.f32 %v696_v47, 6.0  ;;  %v770_v52 = vmin.f32 %v721_v48, 6.0  ;;  %v547_v53 = vadd.f32 %v1420_v11, %v319_v49  ;;  %v572_v54 = vadd.f32 %v1420_v11, %v444_v50 }
 0x111   :  { %v1009_v55 = vpop.f32.mrf.mxu0  ;;  %v1084_v56 = vpop.f32.mrf.mxu1 }
 0x112   :  { %794 = vst [vmem:[#allocation8 + $0x18] sm:$0xff] %v745_v51  ;;  %819 = vst [vmem:[#allocation8 + $0xe0] sm:$0xff] %v770_v52  ;;  %v697_v57 = vmax.f32 %v547_v53, 0.0  ;;  %v722_v58 = vmax.f32 %v572_v54, 0.0 }
 0x113   :  { %v324_v59 = vpop.f32.mrf.mxu0  ;;  %v449_v60 = vpop.f32.mrf.mxu1 }
 0x114   :  { %v746_v61 = vmin.f32 %v697_v57, 6.0  ;;  %v771_v62 = vmin.f32 %v722_v58, 6.0  ;;  %v548_v63 = vadd.f32 %v1420_v11, %v324_v59  ;;  %v573_v1 = vadd.f32 %v1420_v11, %v449_v60 }
 0x115   :  { %v1012_v2 = vpop.f32.mrf.mxu0  ;;  %v1087_v3 = vpop.f32.mrf.mxu1 }
 0x116   :  { %795 = vst [vmem:[#allocation8 + $0x20] sm:$0xff] %v746_v61  ;;  %820 = vst [vmem:[#allocation8 + $0xe8] sm:$0xff] %v771_v62  ;;  %v698_v4 = vmax.f32 %v548_v63, 0.0  ;;  %v723_v5 = vmax.f32 %v573_v1, 0.0 }
 0x117   :  { %v329_v6 = vpop.f32.mrf.mxu0  ;;  %v454_v7 = vpop.f32.mrf.mxu1 }
 0x118   :  { %v747_v8 = vmin.f32 %v698_v4, 6.0  ;;  %v772_v9 = vmin.f32 %v723_v5, 6.0  ;;  %v549_v10 = vadd.f32 %v1420_v11, %v329_v6  ;;  %v574_v12 = vadd.f32 %v1420_v11, %v454_v7 }
 0x119   :  { %v1015_v13 = vpop.f32.mrf.mxu0  ;;  %v1090_v14 = vpop.f32.mrf.mxu1 }
 0x11a   :  { %796 = vst [vmem:[#allocation8 + $0x28] sm:$0xff] %v747_v8  ;;  %821 = vst [vmem:[#allocation8 + $0xf0] sm:$0xff] %v772_v9  ;;  %v699_v15 = vmax.f32 %v549_v10, 0.0  ;;  %v724_v16 = vmax.f32 %v574_v12, 0.0 }
 0x11b   :  { %v334_v17 = vpop.f32.mrf.mxu0  ;;  %v459_v18 = vpop.f32.mrf.mxu1 }
 0x11c   :  { %v748_v19 = vmin.f32 %v699_v15, 6.0  ;;  %v773_v20 = vmin.f32 %v724_v16, 6.0  ;;  %v550_v21 = vadd.f32 %v1420_v11, %v334_v17  ;;  %v575_v0 = vadd.f32 %v1420_v11, %v459_v18 }
 0x11d   :  { %v1018_v22 = vpop.f32.mrf.mxu0  ;;  %v1093_v23 = vpop.f32.mrf.mxu1 }
 0x11e   :  { %797 = vst [vmem:[#allocation8 + $0x30] sm:$0xff] %v748_v19  ;;  %822 = vst [vmem:[#allocation8 + $0xf8] sm:$0xff] %v773_v20  ;;  %v700_v24 = vmax.f32 %v550_v21, 0.0  ;;  %v725_v25 = vmax.f32 %v575_v0, 0.0 }
 0x11f   :  { %v339_v26 = vpop.f32.mrf.mxu0  ;;  %v464_v27 = vpop.f32.mrf.mxu1 }
 0x120   :  { %v749_v28 = vmin.f32 %v700_v24, 6.0  ;;  %v774_v29 = vmin.f32 %v725_v25, 6.0  ;;  %v551_v30 = vadd.f32 %v1420_v11, %v339_v26  ;;  %v576_v31 = vadd.f32 %v1420_v11, %v464_v27 }
 0x121   :  { %v1021_v32 = vpop.f32.mrf.mxu0  ;;  %v1096_v33 = vpop.f32.mrf.mxu1 }
 0x122   :  { %798 = vst [vmem:[#allocation8 + $0x38] sm:$0xff] %v749_v28  ;;  %823 = vst [vmem:[#allocation8 + $0x100] sm:$0xff] %v774_v29  ;;  %v701_v34 = vmax.f32 %v551_v30, 0.0  ;;  %v726_v35 = vmax.f32 %v576_v31, 0.0 }
 0x123   :  { %v344_v36 = vpop.f32.mrf.mxu0  ;;  %v469_v37 = vpop.f32.mrf.mxu1 }
 0x124   :  { %v750_v38 = vmin.f32 %v701_v34, 6.0  ;;  %v775_v39 = vmin.f32 %v726_v35, 6.0  ;;  %v552_v40 = vadd.f32 %v1420_v11, %v344_v36  ;;  %v577_v41 = vadd.f32 %v1420_v11, %v469_v37 }
 0x125   :  { %v1024_v42 = vpop.f32.mrf.mxu0  ;;  %v1099_v43 = vpop.f32.mrf.mxu1 }
 0x126   :  { %799 = vst [vmem:[#allocation8 + $0x40] sm:$0xff] %v750_v38  ;;  %824 = vst [vmem:[#allocation8 + $0x108] sm:$0xff] %v775_v39  ;;  %v702_v44 = vmax.f32 %v552_v40, 0.0  ;;  %v727_v45 = vmax.f32 %v577_v41, 0.0 }
 0x127   :  { %v349_v46 = vpop.f32.mrf.mxu0  ;;  %v474_v47 = vpop.f32.mrf.mxu1 }
 0x128   :  { %v751_v48 = vmin.f32 %v702_v44, 6.0  ;;  %v776_v49 = vmin.f32 %v727_v45, 6.0  ;;  %v553_v50 = vadd.f32 %v1420_v11, %v349_v46  ;;  %v578_v51 = vadd.f32 %v1420_v11, %v474_v47 }
 0x129   :  { %v1027_v52 = vpop.f32.mrf.mxu0  ;;  %v1102_v53 = vpop.f32.mrf.mxu1 }
 0x12a   :  { %800 = vst [vmem:[#allocation8 + $0x48] sm:$0xff] %v751_v48  ;;  %825 = vst [vmem:[#allocation8 + $0x110] sm:$0xff] %v776_v49  ;;  %v703_v54 = vmax.f32 %v553_v50, 0.0  ;;  %v728_v55 = vmax.f32 %v578_v51, 0.0 }
 0x12b   :  { %v354_v56 = vpop.f32.mrf.mxu0  ;;  %v479_v57 = vpop.f32.mrf.mxu1 }
 0x12c   :  { %v752_v58 = vmin.f32 %v703_v54, 6.0  ;;  %v777_v59 = vmin.f32 %v728_v55, 6.0  ;;  %v554_v60 = vadd.f32 %v1420_v11, %v354_v56  ;;  %v579_v61 = vadd.f32 %v1420_v11, %v479_v57 }
 0x12d   :  { %v1030_v62 = vpop.f32.mrf.mxu0  ;;  %v1105_v63 = vpop.f32.mrf.mxu1 }
 0x12e   :  { %801 = vst [vmem:[#allocation8 + $0x50] sm:$0xff] %v752_v58  ;;  %826 = vst [vmem:[#allocation8 + $0x118] sm:$0xff] %v777_v59  ;;  %v704_v1 = vmax.f32 %v554_v60, 0.0  ;;  %v729_v2 = vmax.f32 %v579_v61, 0.0 }
 0x12f   :  { %v359_v3 = vpop.f32.mrf.mxu0  ;;  %v484_v4 = vpop.f32.mrf.mxu1 }
 0x130   :  { %v753_v5 = vmin.f32 %v704_v1, 6.0  ;;  %v778_v6 = vmin.f32 %v729_v2, 6.0  ;;  %v555_v7 = vadd.f32 %v1420_v11, %v359_v3  ;;  %v580_v8 = vadd.f32 %v1420_v11, %v484_v4 }
 0x131   :  { %v1033_v9 = vpop.f32.mrf.mxu0  ;;  %v1108_v10 = vpop.f32.mrf.mxu1 }
 0x132   :  { %802 = vst [vmem:[#allocation8 + $0x58] sm:$0xff] %v753_v5  ;;  %827 = vst [vmem:[#allocation8 + $0x120] sm:$0xff] %v778_v6  ;;  %v705_v12 = vmax.f32 %v555_v7, 0.0  ;;  %v730_v13 = vmax.f32 %v580_v8, 0.0 }
 0x133   :  { %v364_v14 = vpop.f32.mrf.mxu0  ;;  %v489_v15 = vpop.f32.mrf.mxu1 }
 0x134   :  { %v754_v16 = vmin.f32 %v705_v12, 6.0  ;;  %v779_v17 = vmin.f32 %v730_v13, 6.0  ;;  %v556_v18 = vadd.f32 %v1420_v11, %v364_v14  ;;  %v581_v19 = vadd.f32 %v1420_v11, %v489_v15 }
 0x135   :  { %v1036_v20 = vpop.f32.mrf.mxu0  ;;  %v1111_v21 = vpop.f32.mrf.mxu1 }
 0x136   :  { %803 = vst [vmem:[#allocation8 + $0x60] sm:$0xff] %v754_v16  ;;  %828 = vst [vmem:[#allocation8 + $0x128] sm:$0xff] %v779_v17  ;;  %v706_v0 = vmax.f32 %v556_v18, 0.0  ;;  %v731_v22 = vmax.f32 %v581_v19, 0.0 }
 0x137   :  { %v369_v23 = vpop.f32.mrf.mxu0  ;;  %v494_v24 = vpop.f32.mrf.mxu1 }
 0x138   :  { %v755_v25 = vmin.f32 %v706_v0, 6.0  ;;  %v780_v26 = vmin.f32 %v731_v22, 6.0  ;;  %v557_v27 = vadd.f32 %v1420_v11, %v369_v23  ;;  %v582_v28 = vadd.f32 %v1420_v11, %v494_v24 }
 0x139   :  { %v1039_v29 = vpop.f32.mrf.mxu0  ;;  %v1114_v30 = vpop.f32.mrf.mxu1 }
 0x13a   :  { %804 = vst [vmem:[#allocation8 + $0x68] sm:$0xff] %v755_v25  ;;  %829 = vst [vmem:[#allocation8 + $0x130] sm:$0xff] %v780_v26  ;;  %v707_v31 = vmax.f32 %v557_v27, 0.0  ;;  %v732_v32 = vmax.f32 %v582_v28, 0.0 }
 0x13b   :  { %v374_v33 = vpop.f32.mrf.mxu0  ;;  %v499_v34 = vpop.f32.mrf.mxu1 }
 0x13c   :  { %v756_v35 = vmin.f32 %v707_v31, 6.0  ;;  %v781_v36 = vmin.f32 %v732_v32, 6.0  ;;  %v558_v37 = vadd.f32 %v1420_v11, %v374_v33  ;;  %v583_v38 = vadd.f32 %v1420_v11, %v499_v34 }
 0x13d   :  { %v1042_v39 = vpop.f32.mrf.mxu0  ;;  %v1117_v40 = vpop.f32.mrf.mxu1 }
 0x13e   :  { %805 = vst [vmem:[#allocation8 + $0x70] sm:$0xff] %v756_v35  ;;  %830 = vst [vmem:[#allocation8 + $0x138] sm:$0xff] %v781_v36  ;;  %v708_v41 = vmax.f32 %v558_v37, 0.0  ;;  %v733_v42 = vmax.f32 %v583_v38, 0.0 }
 0x13f   :  { %v379_v43 = vpop.f32.mrf.mxu0  ;;  %v504_v44 = vpop.f32.mrf.mxu1 }
 0x140   :  { %v757_v45 = vmin.f32 %v708_v41, 6.0  ;;  %v782_v46 = vmin.f32 %v733_v42, 6.0  ;;  %v559_v47 = vadd.f32 %v1420_v11, %v379_v43  ;;  %v584_v48 = vadd.f32 %v1420_v11, %v504_v44 }
 0x141   :  { %v1045_v49 = vpop.f32.mrf.mxu0  ;;  %v1120_v50 = vpop.f32.mrf.mxu1 }
 0x142   :  { %806 = vst [vmem:[#allocation8 + $0x78] sm:$0xff] %v757_v45  ;;  %831 = vst [vmem:[#allocation8 + $0x140] sm:$0xff] %v782_v46  ;;  %v709_v51 = vmax.f32 %v559_v47, 0.0  ;;  %v734_v52 = vmax.f32 %v584_v48, 0.0 }
 0x143   :  { %v384_v53 = vpop.f32.mrf.mxu0  ;;  %v509_v54 = vpop.f32.mrf.mxu1 }
 0x144   :  { %v758_v55 = vmin.f32 %v709_v51, 6.0  ;;  %v783_v56 = vmin.f32 %v734_v52, 6.0  ;;  %v560_v57 = vadd.f32 %v1420_v11, %v384_v53  ;;  %v585_v58 = vadd.f32 %v1420_v11, %v509_v54 }
 0x145   :  { %v1048_v59 = vpop.f32.mrf.mxu0  ;;  %v1123_v60 = vpop.f32.mrf.mxu1 }
 0x146   :  { %807 = vst [vmem:[#allocation8 + $0x80] sm:$0xff] %v758_v55  ;;  %832 = vst [vmem:[#allocation8 + $0x148] sm:$0xff] %v783_v56  ;;  %v710_v61 = vmax.f32 %v560_v57, 0.0  ;;  %v735_v62 = vmax.f32 %v585_v58, 0.0 }
 0x147   :  { %v389_v63 = vpop.f32.mrf.mxu0  ;;  %v514_v1 = vpop.f32.mrf.mxu1 }
 0x148   :  { %v759_v2 = vmin.f32 %v710_v61, 6.0  ;;  %v784_v3 = vmin.f32 %v735_v62, 6.0  ;;  %v561_v4 = vadd.f32 %v1420_v11, %v389_v63  ;;  %v586_v5 = vadd.f32 %v1420_v11, %v514_v1 }
 0x149   :  { %v1051_v6 = vpop.f32.mrf.mxu0  ;;  %v1126_v7 = vpop.f32.mrf.mxu1 }
 0x14a   :  { %808 = vst [vmem:[#allocation8 + $0x88] sm:$0xff] %v759_v2  ;;  %833 = vst [vmem:[#allocation8 + $0x150] sm:$0xff] %v784_v3  ;;  %v711_v8 = vmax.f32 %v561_v4, 0.0  ;;  %v736_v9 = vmax.f32 %v586_v5, 0.0 }
 0x14b   :  { %v394_v10 = vpop.f32.mrf.mxu0  ;;  %v519_v12 = vpop.f32.mrf.mxu1 }
 0x14c   :  { %v760_v13 = vmin.f32 %v711_v8, 6.0  ;;  %v785_v14 = vmin.f32 %v736_v9, 6.0  ;;  %v562_v15 = vadd.f32 %v1420_v11, %v394_v10  ;;  %v587_v16 = vadd.f32 %v1420_v11, %v519_v12 }
 0x14d   :  { %v1054_v17 = vpop.f32.mrf.mxu0  ;;  %v1129_v18 = vpop.f32.mrf.mxu1 }
 0x14e   :  { %809 = vst [vmem:[#allocation8 + $0x90] sm:$0xff] %v760_v13  ;;  %834 = vst [vmem:[#allocation8 + $0x158] sm:$0xff] %v785_v14  ;;  %v712_v19 = vmax.f32 %v562_v15, 0.0  ;;  %v737_v20 = vmax.f32 %v587_v16, 0.0 }
 0x14f   :  { %v399_v21 = vpop.f32.mrf.mxu0  ;;  %v524_v0 = vpop.f32.mrf.mxu1 }
 0x150   :  { %v761_v22 = vmin.f32 %v712_v19, 6.0  ;;  %v786_v23 = vmin.f32 %v737_v20, 6.0  ;;  %v563_v24 = vadd.f32 %v1420_v11, %v399_v21  ;;  %v588_v25 = vadd.f32 %v1420_v11, %v524_v0 }
 0x151   :  { %v1057_v26 = vpop.f32.mrf.mxu0  ;;  %v1132_v27 = vpop.f32.mrf.mxu1 }
 0x152   :  { %810 = vst [vmem:[#allocation8 + $0x98] sm:$0xff] %v761_v22  ;;  %835 = vst [vmem:[#allocation8 + $0x160] sm:$0xff] %v786_v23  ;;  %v713_v28 = vmax.f32 %v563_v24, 0.0  ;;  %v738_v29 = vmax.f32 %v588_v25, 0.0 }
 0x153   :  { %v404_v30 = vpop.f32.mrf.mxu0  ;;  %v529_v31 = vpop.f32.mrf.mxu1 }
 0x154   :  { %v762_v32 = vmin.f32 %v713_v28, 6.0  ;;  %v787_v33 = vmin.f32 %v738_v29, 6.0  ;;  %v564_v34 = vadd.f32 %v1420_v11, %v404_v30  ;;  %v589_v35 = vadd.f32 %v1420_v11, %v529_v31 }
 0x155   :  { %v1060_v36 = vpop.f32.mrf.mxu0  ;;  %v1135_v37 = vpop.f32.mrf.mxu1 }
 0x156   :  { %811 = vst [vmem:[#allocation8 + $0xa0] sm:$0xff] %v762_v32  ;;  %836 = vst [vmem:[#allocation8 + $0x168] sm:$0xff] %v787_v33  ;;  %v714_v38 = vmax.f32 %v564_v34, 0.0  ;;  %v739_v39 = vmax.f32 %v589_v35, 0.0 }
 0x157   :  { %v409_v40 = vpop.f32.mrf.mxu0  ;;  %v534_v41 = vpop.f32.mrf.mxu1 }
 0x158   :  { %v763_v42 = vmin.f32 %v714_v38, 6.0  ;;  %v788_v43 = vmin.f32 %v739_v39, 6.0  ;;  %v565_v44 = vadd.f32 %v1420_v11, %v409_v40  ;;  %v590_v45 = vadd.f32 %v1420_v11, %v534_v41 }
 0x159   :  { %v1063_v46 = vpop.f32.mrf.mxu0  ;;  %v1138_v47 = vpop.f32.mrf.mxu1 }
 0x15a   :  { %812 = vst [vmem:[#allocation8 + $0xa8] sm:$0xff] %v763_v42  ;;  %837 = vst [vmem:[#allocation8 + $0x170] sm:$0xff] %v788_v43  ;;  %v715_v48 = vmax.f32 %v565_v44, 0.0  ;;  %v740_v49 = vmax.f32 %v590_v45, 0.0 }
 0x15b   :  { %v414_v50 = vpop.f32.mrf.mxu0  ;;  %v539_v51 = vpop.f32.mrf.mxu1 }
 0x15c   :  { %v764_v52 = vmin.f32 %v715_v48, 6.0  ;;  %v789_v53 = vmin.f32 %v740_v49, 6.0  ;;  %v566_v54 = vadd.f32 %v1420_v11, %v414_v50  ;;  %v591_v55 = vadd.f32 %v1420_v11, %v539_v51 }
 0x15d   :  { %v1066_v56 = vpop.f32.mrf.mxu0  ;;  %v1141_v57 = vpop.f32.mrf.mxu1 }
 0x15e   :  { %813 = vst [vmem:[#allocation8 + $0xb0] sm:$0xff] %v764_v52  ;;  %838 = vst [vmem:[#allocation8 + $0x178] sm:$0xff] %v789_v53  ;;  %v716_v58 = vmax.f32 %v566_v54, 0.0  ;;  %v741_v59 = vmax.f32 %v591_v55, 0.0 }
 0x15f   :  { %v419_v60 = vpop.f32.mrf.mxu0 }
 0x160   :  { %v765_v61 = vmin.f32 %v716_v58, 6.0  ;;  %v790_v62 = vmin.f32 %v741_v59, 6.0  ;;  %v567_v63 = vadd.f32 %v1420_v11, %v419_v60 }
 0x161   :  { %v1069_v1 = vpop.f32.mrf.mxu0 }
 0x162   :  { %814 = vst [vmem:[#allocation8 + $0xb8] sm:$0xff] %v765_v61  ;;  %839 = vst [vmem:[#allocation8 + $0x180] sm:$0xff] %v790_v62  ;;  %v717_v2 = vmax.f32 %v567_v63, 0.0 }
 0x164   :  { %v766_v3 = vmin.f32 %v717_v2, 6.0 }
 0x166   :  { %815 = vst [vmem:[#allocation8 + $0xc0] sm:$0xff] %v766_v3 }
 0x167   :  { %1234 = shalt.err (!%p1231_p0)
}
 0x168   :  { %851 = dma.vmem_to_hbm [thread:$0]  %s846_s26, 6272, %s1480_s3, [#allocation5], %s1250_s15, %s1250_s15, %s1251_s16  }
 0x169   :  { %1247 = dma.done.wait [#allocation5], 6272  }
 0x16a   :  { %1248 = vsyncadd [#allocation5], 4294961024 }
 0x16b   :  { %855 = vsyncpa [#allocation4], 1 }
 0x16c   :  { %856 = vsyncpa [#allocation7], 1 }
 0x16d   :  { %857 = vsyncpa [#allocation5], 1 }

</bundles_post_ra>
